<compile_context>
chip_gen: v6e
topology: v6e:2x2x1
jax: 0.10.0
libtpu: 0.0.40
codegen_flags: <defaults>
</compile_context>

<pallas_src>
import functools

import jax
import jax.numpy as jnp
from jax.experimental import pallas as pl
from jax.experimental.pallas import tpu as pltpu

_MIB = 1024 * 1024


# ----------------------------- helpers --------------------------------------


def _round_up(x, m):
    return ((x + m - 1) // m) * m


def _sublane(dtype):
    # Minimum sublane tile: 8 for f32, 16 for bf16, 32 for int8.
    return max(8, 32 // jnp.dtype(dtype).itemsize)


def _pick_tile(dim, default, align, max_overpad=1.3):
    """Largest tile <= `default` (multiple of `align`) whose induced padding of
    `dim` stays within `max_overpad` x the minimally aligned size."""
    default = max(align, (default // align) * align)
    base = _round_up(dim, align)
    best = align
    t = align
    while t <= default:
        if _round_up(dim, t) <= max_overpad * base:
            best = t
        t += align
    return best


# ----------------------------- kernels --------------------------------------


def _fc_acc_kernel(x_ref, w_ref, o_ref, acc_ref):
    # Multi-K-step, no bias.  x:(tm,tk) @ w:(tk,tn) accumulated in f32.
    @pl.when(pl.program_id(2) == 0)
    def _init():
        acc_ref[...] = jnp.zeros_like(acc_ref)

    acc_ref[...] += jnp.dot(
        x_ref[...], w_ref[...], preferred_element_type=jnp.float32
    )

    @pl.when(pl.program_id(2) == pl.num_programs(2) - 1)
    def _finalize():
        o_ref[...] = acc_ref[...].astype(o_ref.dtype)


def _fc_acc_bias_kernel(x_ref, w_ref, b_ref, o_ref, acc_ref):
    # Multi-K-step with a (1, tn) bias tile added once, at K-finalize.
    @pl.when(pl.program_id(2) == 0)
    def _init():
        acc_ref[...] = jnp.zeros_like(acc_ref)

    acc_ref[...] += jnp.dot(
        x_ref[...], w_ref[...], preferred_element_type=jnp.float32
    )

    @pl.when(pl.program_id(2) == pl.num_programs(2) - 1)
    def _finalize():
        o_ref[...] = (acc_ref[...] + b_ref[...].astype(jnp.float32)).astype(
            o_ref.dtype
        )


def _fc_direct_kernel(x_ref, w_ref, o_ref):
    # Single K step: no accumulator scratch, no finalize copy.
    o_ref[...] = jnp.dot(
        x_ref[...], w_ref[...], preferred_element_type=jnp.float32
    ).astype(o_ref.dtype)


def _fc_direct_bias_kernel(x_ref, w_ref, b_ref, o_ref):
    acc = jnp.dot(x_ref[...], w_ref[...], preferred_element_type=jnp.float32)
    o_ref[...] = (acc + b_ref[...].astype(jnp.float32)).astype(o_ref.dtype)


# --------------------------- pallas builder ----------------------------------


def _fc_pallas(xp, wp, bp, *, tm, tn, tk, out_dtype):
    Mp, Kp = xp.shape
    Kp2, Np = wp.shape
    assert Kp == Kp2
    mb, nb, kb = Mp // tm, Np // tn, Kp // tk
    grid = (mb, nb, kb)  # reduction (K) axis last
    single_k = kb == 1

    x_spec = pl.BlockSpec((tm, tk), lambda i, j, k: (i, k))
    o_spec = pl.BlockSpec((tm, tn), lambda i, j, k: (i, j))

    # Deeper pipelining on the streamed weight operand in the memory-bound
    # small-M (single M block) regime, when there are enough weight blocks.
    if mb == 1 and nb * kb >= 3:
        w_bufs = 3
        w_spec = pl.BlockSpec(
            (tk, tn), lambda i, j, k: (k, j), pipeline_mode=pl.Buffered(3)
        )
    else:
        w_bufs = 2
        w_spec = pl.BlockSpec((tk, tn), lambda i, j, k: (k, j))

    isz = jnp.dtype(xp.dtype).itemsize
    osz = jnp.dtype(out_dtype).itemsize

    scratch = [] if single_k else [pltpu.VMEM((tm, tn), jnp.float32)]

    # VMEM budget: double-buffered x/out, (2 or 3)-buffered weight, accumulator
    # scratch, bias.  >=32 MiB (safe everywhere), <=48 MiB (v7x headroom).
    vmem_est = (
        2 * tm * tk * isz
        + w_bufs * tk * tn * isz
        + 2 * tm * tn * osz
        + (0 if single_k else tm * tn * 4)
        + 2 * tn * 4
    )
    vmem_limit = int(min(max(1.25 * vmem_est + 8 * _MIB, 32 * _MIB), 48 * _MIB))

    bias_bytes = 0 if bp is None else Np * 4
    cost = pl.CostEstimate(
        flops=2 * Mp * Np * Kp,
        transcendentals=0,
        bytes_accessed=Mp * Kp * isz + Kp * Np * isz + Mp * Np * osz + bias_bytes,
    )

    compiler_params = pltpu.CompilerParams(
        dimension_semantics=("parallel", "parallel", "arbitrary"),
        vmem_limit_bytes=vmem_limit,
    )
    out_shape = jax.ShapeDtypeStruct((Mp, Np), out_dtype)

    if bp is None:
        kernel = _fc_direct_kernel if single_k else _fc_acc_kernel
        in_specs = [x_spec, w_spec]
        operands = (xp, wp)
    else:
        kernel = _fc_direct_bias_kernel if single_k else _fc_acc_bias_kernel
        b_spec = pl.BlockSpec((1, tn), lambda i, j, k: (0, j))
        in_specs = [x_spec, w_spec, b_spec]
        operands = (xp, wp, bp)

    return pl.pallas_call(
        kernel,
        out_shape=out_shape,
        grid_spec=pltpu.PrefetchScalarGridSpec(
            num_scalar_prefetch=0,
            grid=grid,
            in_specs=in_specs,
            out_specs=o_spec,
            scratch_shapes=scratch,
        ),
        compiler_params=compiler_params,
        cost_estimate=cost,
    )(*operands)


# ----------------------------- apply path ------------------------------------


@functools.partial(
    jax.jit, static_argnames=("n_out", "tm_default", "tn", "tk", "use_bf16")
)
def _fc_apply(x, w_kn, b_pad, *, n_out, tm_default, tn, tk, use_bf16):
    M, K = x.shape
    Kp, Np = w_kn.shape
    in_dtype = jnp.bfloat16 if use_bf16 else x.dtype
    sl = _sublane(in_dtype)

    tm = _pick_tile(M, tm_default, sl)
    Mp = _round_up(M, tm)

    # Guarantee >= 2 blocks along a parallel axis when possible so v7x's second
    # TensorCore gets work (no-op on v5e/v6e, no-op if dims are one tile wide).
    if Mp // tm == 1 and Np // tn == 1:
        if tn >= 256:
            for cand in range(tn - 128, 127, -128):  # 128-multiple dividing Np
                if Np % cand == 0:
                    tn = cand
                    break
        elif tm >= 2 * sl:
            tm = _round_up(tm // 2, sl)
            Mp = _round_up(M, tm)

    # Pad the input only if the problem is ragged (weight is pre-padded/cached).
    xp = x
    if Mp != M or Kp != K:
        xp = jnp.pad(x, ((0, Mp - M), (0, Kp - K)))
    if xp.dtype != in_dtype:
        xp = xp.astype(in_dtype)

    out = _fc_pallas(xp, w_kn, b_pad, tm=tm, tn=tn, tk=tk, out_dtype=x.dtype)
    if Mp != M or Np != n_out:
        out = out[:M, :n_out]
    return out


# ----------------------------- public API ------------------------------------


def xavier_uniform(key, shape, dtype=jnp.float32):
    # Matches torch nn.init.xavier_uniform_: U(-a, a), a = sqrt(6/(fan_in+fan_out))
    fan_out, fan_in = shape  # weight is (output_features, input_features)
    a = (6.0 / (fan_in + fan_out)) ** 0.5
    return jax.random.uniform(key, shape, dtype=dtype, minval=-a, maxval=a)


class FullyConnected:
    """Pallas-TPU port of SEGAN's FullyConnected module (forward pass).

    Weight is stored ONCE in padded, transposed (K, N) layout at construction,
    so per-call there is no weight transpose/pad HBM round trip.
    """

    def __init__(self, input_features, output_features, bias=True, *,
                 weight=None, bias_value=None, key=None,
                 tm=512, tn=512, tk=1024, use_bf16=False):
        self.input_features = int(input_features)
        self.output_features = int(output_features)
        self.use_bf16 = bool(use_bf16)
        self._tm_default = int(tm)

        if weight is None:
            if key is None:
                key = jax.random.PRNGKey(0)
            weight = xavier_uniform(key, (self.output_features, self.input_features))
        weight = jnp.asarray(weight, dtype=jnp.float32)
        assert weight.shape == (self.output_features, self.input_features)
        self.weight = weight  # torch-layout (N, K) copy, kept for reference use

        N, K = weight.shape
        self._tn = _pick_tile(N, int(tn), 128)
        self._tk = _pick_tile(K, int(tk), 128)
        Np = _round_up(N, self._tn)
        Kp = _round_up(K, self._tk)

        # One fused pad+transpose, cached in HBM in lane-dense (Kp, Np) layout.
        w_kn = jnp.pad(weight, ((0, Np - N), (0, Kp - K))).T
        if self.use_bf16:
            w_kn = w_kn.astype(jnp.bfloat16)
        self.weight_kn = jax.block_until_ready(w_kn)

        if bias:
            if bias_value is None:
                b = jnp.zeros((N,), jnp.float32)  # module zeroes the bias
            else:
                b = jnp.asarray(bias_value, jnp.float32).reshape(N)
            self.bias = b
            self.bias_pad = jax.block_until_ready(
                jnp.pad(b, (0, Np - N)).reshape(1, Np)
            )
        else:
            self.bias = None
            self.bias_pad = None

    def __call__(self, x):
        x = jnp.asarray(x)
        assert x.ndim == 2 and x.shape[1] == self.input_features
        # TODO(synk): backward (grad_input/grad_weight/grad_bias) is left to
        # autodiff of the wrapper rather than explicit Pallas kernels.
        return _fc_apply(
            x, self.weight_kn, self.bias_pad,
            n_out=self.output_features,
            tm_default=self._tm_default,
            tn=self._tn, tk=self._tk,
            use_bf16=self.use_bf16,
        )


def fully_connected(x, weight, bias=None, *, tm=512, tn=512, tk=1024,
                    use_bf16=False):
    """One-shot functional form: x @ weight.T (+ bias).

    For repeated calls with the same weight, construct `FullyConnected` once —
    it caches the pre-transposed/padded weight and avoids per-call HBM copies.
    """
    x = jnp.asarray(x)
    weight = jnp.asarray(weight)
    M, K = x.shape
    N, K2 = weight.shape
    assert K == K2, "input_features mismatch"
    layer = FullyConnected(
        K, N, bias=bias is not None, weight=weight, bias_value=bias,
        tm=tm, tn=tn, tk=tk, use_bf16=use_bf16,
    )
    return layer(x)


# ------------------------------- tests ---------------------------------------


if __name__ == "__main__":
    key = jax.random.PRNGKey(0)
    k_x, k_w, k_x2, k_w2, k_b2, k_x5, k_w5 = jax.random.split(key, 7)

    # --- case 1: module-sized small example (batch=8, in=32, out=64),
    #     zero bias (as module init) -> single-K direct kernel, no padding.
    batch, in_f, out_f = 8, 32, 64
    x = jax.random.normal(k_x, (batch, in_f), dtype=jnp.float32)
    layer = FullyConnected(in_f, out_f, bias=True, key=k_w)
    out = jax.block_until_ready(layer(x))
    ref = x @ layer.weight.T + layer.bias[None, :]
    assert out.shape == (batch, out_f)
    assert jnp.allclose(out, ref, atol=1e-5, rtol=1e-5), "case1 mismatch"

    # --- case 2: ragged dims, real bias, small tiles -> multi-block grid with
    #     K accumulation and M/N/K padding.
    M2, K2d, N2 = 300, 200, 160
    x2 = jax.random.normal(k_x2, (M2, K2d), dtype=jnp.float32)
    w2 = xavier_uniform(k_w2, (N2, K2d))
    b2 = jax.random.normal(k_b2, (N2,), dtype=jnp.float32)
    layer2 = FullyConnected(K2d, N2, bias=True, weight=w2, bias_value=b2,
                            tm=128, tn=128, tk=128)
    out2 = jax.block_until_ready(layer2(x2))
    ref2 = x2 @ w2.T + b2[None, :]
    assert out2.shape == (M2, N2)
    assert jnp.allclose(out2, ref2, atol=1e-4, rtol=1e-4), "case2 mismatch"

    # --- case 3: bias=None functional path (no zero-bias fabrication).
    out3 = jax.block_until_ready(fully_connected(x, layer.weight, None))
    assert jnp.allclose(out3, x @ layer.weight.T, atol=1e-5, rtol=1e-5), "case3"

    # --- case 4: opt-in bf16 MXU path (f32 accumulate/bias/output).
    layer4 = FullyConnected(K2d, N2, bias=True, weight=w2, bias_value=b2,
                            use_bf16=True)
    out4 = jax.block_until_ready(layer4(x2))
    assert jnp.allclose(out4, ref2, atol=5e-2, rtol=5e-2), "case4 mismatch"

    # --- case 5: single-M-block weight-streaming regime (batch=8, in=384,
    #     out=256, 128-tiles) -> accumulator + triple-buffered weight spec.
    M5, K5, N5 = 8, 384, 256
    x5 = jax.random.normal(k_x5, (M5, K5), dtype=jnp.float32)
    w5 = xavier_uniform(k_w5, (N5, K5))
    layer5 = FullyConnected(K5, N5, bias=False, weight=w5, tn=128, tk=128)
    out5 = jax.block_until_ready(layer5(x5))
    ref5 = x5 @ w5.T
    assert out5.shape == (M5, N5)
    assert jnp.allclose(out5, ref5, atol=1e-3, rtol=1e-3), "case5 mismatch"

    print("KERNEL_OK")
</pallas_src>

<mosaic_0001>
module attributes {stable_mosaic.version = 11 : i64} {
  func.func @_fc_direct_bias_kernel(%arg0: i32, %arg1: i32, %arg2: i32, %arg3: memref<8x128xf32, #tpu.memory_space<vmem>>, %arg4: memref<128x128xf32, #tpu.memory_space<vmem>>, %arg5: memref<1x128xf32, #tpu.memory_space<vmem>>, %arg6: memref<8x128xf32, #tpu.memory_space<vmem>>) attributes {dimension_semantics = [#tpu.dimension_semantics<parallel>, #tpu.dimension_semantics<parallel>, #tpu.dimension_semantics<arbitrary>], iteration_bounds = array<i64: 1, 1, 1>, scalar_prefetch = 0 : i64, scratch_operands = 0 : i64, tpu.core_type = #tpu.core_type<tc>, window_params = [{transform_indices = @transform_0, window_bounds = array<i64: 8, 128>}, {transform_indices = @transform_1, window_bounds = array<i64: 128, 128>}, {transform_indices = @transform_2, window_bounds = array<i64: 1, 128>}, {transform_indices = @transform_3, window_bounds = array<i64: 8, 128>}]} {
    %c0 = arith.constant 0 : index
    %c0_0 = arith.constant 0 : index
    %0 = vector.load %arg3[%c0, %c0_0] : memref<8x128xf32, #tpu.memory_space<vmem>>, vector<8x128xf32>
    %c0_1 = arith.constant 0 : index
    %c0_2 = arith.constant 0 : index
    %1 = vector.load %arg4[%c0_1, %c0_2] : memref<128x128xf32, #tpu.memory_space<vmem>>, vector<128x128xf32>
    %cst = arith.constant dense<0.000000e+00> : vector<8x128xf32>
    %2 = tpu.matmul %0, %1, %cst {dimension_numbers = #tpu.dot_dimension_numbers<[1], [0], [0], [1], [0, 0, 1, 1], [], []>} : vector<8x128xf32>, vector<128x128xf32>, vector<8x128xf32> -> vector<8x128xf32>
    %c0_3 = arith.constant 0 : index
    %c0_4 = arith.constant 0 : index
    %3 = vector.load %arg5[%c0_3, %c0_4] : memref<1x128xf32, #tpu.memory_space<vmem>>, vector<1x128xf32>
    %4 = vector.broadcast %3 : vector<1x128xf32> to vector<8x128xf32>
    %5 = arith.addf %2, %4 : vector<8x128xf32>
    %c0_5 = arith.constant 0 : index
    %c0_6 = arith.constant 0 : index
    %6 = vector.load %arg6[%c0_5, %c0_6] : memref<8x128xf32, #tpu.memory_space<vmem>>, vector<8x128xf32>
    tpu.vector_store %arg6[%c0_5, %c0_6], %5 {strides = array<i32>} : memref<8x128xf32, #tpu.memory_space<vmem>>, vector<8x128xf32>,
    return
  }
  func.func @transform_0(%arg0: i32, %arg1: i32, %arg2: i32) -> (i32, i32) {
    %c0_i32 = arith.constant 0 : i32
    return %arg0, %arg2 : i32, i32
  }
  func.func @transform_1(%arg0: i32, %arg1: i32, %arg2: i32) -> (i32, i32) {
    %c0_i32 = arith.constant 0 : i32
    return %arg2, %arg1 : i32, i32
  }
  func.func @transform_2(%arg0: i32, %arg1: i32, %arg2: i32) -> (i32, i32) {
    %c0_i32 = arith.constant 0 : i32
    %c0_i32_0 = arith.constant 0 : i32
    return %c0_i32, %arg1 : i32, i32
  }
  func.func @transform_3(%arg0: i32, %arg1: i32, %arg2: i32) -> (i32, i32) {
    %c0_i32 = arith.constant 0 : i32
    return %arg0, %arg1 : i32, i32
  }
}

</mosaic_0001>

<bundles_post_ra>
// kernel: _fc_apply.1
= control target key start
LH: loop header
LB: loop body
LE: loop exit
PB: predicated region body
PF: predicated region fallthrough
CT: control target
= control target key end

     0   :  { %8 = vsyncpa [#allocation3], 0  ;;  %s280_s0 = inlined_call_operand.vmem [shape: f32[8,128], index: 0, kind: input, shape index: {}]   ;;  %s281_s1 = inlined_call_operand.hbm [shape: f32[128,128], index: 1, kind: input, shape index: {}]   ;;  %s282_s2 = inlined_call_operand.vmem [shape: f32[1,128], index: 2, kind: input, shape index: {}]   ;;  %s283_s3 = inlined_call_operand.hbm [shape: f32[8,128], index: 3, kind: output, shape index: {}]  }
   0x1   :  { %9 = vsyncpa [#allocation4], 0  ;;  %s242_s12 = smov [#allocation2]  }
   0x2   :  { %s17_s13 = sshll.u32 %s242_s12, 4  ;;  %s18_s13 = int_to_ptr.vmem [resolvable:$true] %s17_s13 }
   0x3   :  { %s206_s14 = scalar_lea.vmem %s18_s13, 2048  ;;  %p211_p1 = scmp.lt.s32.totalorder %s18_s13, %s18_s13 }
   0x4   :  { %p207_p0 = scmp.ne.s32.totalorder %s18_s13, %s206_s14  ;;  %p212_p2 = scmp.lt.s32.totalorder %s206_s14, %s206_s14 }
   0x6   :  { %p213_p3 = por %p212_p2, %p211_p1 }
   0x8   :  { %p214_p4 = pnand %p213_p3, %p207_p0 }
   0xa   :  { %217 = shalt.err (!%p214_p4)
}
   0xb   :  { %s243_s15 = smov 128   ;;  %s244_s16 = smov 8  }
   0xc   :  { %23 = dma.hbm_to_vmem [thread:$0]  %s281_s1, 2048, %s18_s13, [#allocation3], %s243_s15, %s243_s15, %s244_s16  }
   0xd   :  { %238 = dma.done.wait [#allocation3], 2048  }
   0xe   :  { %239 = vsyncadd [#allocation3], 4294965248  ;;  %v245_v0 = vmov 0.0   ;;  %vm246_vm0 = vmmov 0   ;;  %v45_v1 = vld [vmem:[#allocation2 + $0x78] sm:$0xff]  ;;  %v44_v2 = vld [vmem:[#allocation2 + $0x70] sm:$0xff] }
   0xf   :  { %157 = vmatprep.subr.mxu0 %v245_v0  ;;  %189 = vmatprep.mubr.msk.f32.mxu0 %vm246_vm0, %v245_v0  ;;  %v43_v3 = vld [vmem:[#allocation2 + $0x68] sm:$0xff]  ;;  %v42_v4 = vld [vmem:[#allocation2 + $0x60] sm:$0xff]  ;;  %v41_v5 = vld [vmem:[#allocation2 + $0x58] sm:$0xff]  ;;  %s247_s22 = smov [#allocation5]  }
  0x10   :  { %158 = vmatpush3.msra.mxu0 %v45_v1  ;;  %v40_v6 = vld [vmem:[#allocation2 + $0x50] sm:$0xff]  ;;  %v39_v7 = vld [vmem:[#allocation2 + $0x48] sm:$0xff]  ;;  %v38_v8 = vld [vmem:[#allocation2 + $0x40] sm:$0xff]  ;;  %s130_s23 = sshll.u32 %s247_s22, 4  ;;  %s131_s23 = int_to_ptr.vmem [resolvable:$true] %s130_s23 }
  0x11   :  { %159 = vmatprep.subr.mxu0 %v245_v0  ;;  %v37_v9 = vld [vmem:[#allocation2 + $0x38] sm:$0xff]  ;;  %v36_v10 = vld [vmem:[#allocation2 + $0x30] sm:$0xff]  ;;  %v35_v11 = vld [vmem:[#allocation2 + $0x28] sm:$0xff]  ;;  %s218_s24 = scalar_lea.vmem %s131_s23, 128  ;;  %p223_p6 = scmp.lt.s32.totalorder %s131_s23, %s131_s23 }
  0x12   :  { %160 = vmatpush3.msra.mxu0 %v44_v2  ;;  %v34_v12 = vld [vmem:[#allocation2 + $0x20] sm:$0xff]  ;;  %v33_v13 = vld [vmem:[#allocation2 + $0x18] sm:$0xff]  ;;  %v32_v14 = vld [vmem:[#allocation2 + $0x10] sm:$0xff]  ;;  %p219_p5 = scmp.ne.s32.totalorder %s131_s23, %s218_s24  ;;  %p224_p7 = scmp.lt.s32.totalorder %s218_s24, %s218_s24 }
  0x13   :  { %161 = vmatprep.subr.mxu0 %v245_v0  ;;  %v31_v15 = vld [vmem:[#allocation2 + $0x8] sm:$0xff]  ;;  %v30_v16 = vld [vmem:[#allocation2] sm:$0xff] }
  0x14   :  { %162 = vmatpush3.msra.mxu0 %v43_v3  ;;  %v29_v17 = vld [vmem:[%s280_s0] sm:$0xff]  ;;  %p225_p8 = por %p224_p7, %p223_p6 }
  0x15   :  { %163 = vmatprep.subr.mxu0 %v245_v0  ;;  %v139_v18 = vld [vmem:[%s282_s2] ss:$0 sm:$0xff] }
  0x16   :  { %164 = vmatpush3.msra.mxu0 %v42_v4  ;;  %p226_p9 = pnand %p225_p8, %p219_p5 }
  0x17   :  { %165 = vmatprep.subr.mxu0 %v245_v0 }
  0x18   :  { %166 = vmatpush3.msra.mxu0 %v41_v5 }
  0x19   :  { %167 = vmatprep.subr.mxu0 %v245_v0 }
  0x1a   :  { %168 = vmatpush3.msra.mxu0 %v40_v6 }
  0x1b   :  { %169 = vmatprep.subr.mxu0 %v245_v0 }
  0x1c   :  { %170 = vmatpush3.msra.mxu0 %v39_v7 }
  0x1d   :  { %171 = vmatprep.subr.mxu0 %v245_v0 }
  0x1e   :  { %172 = vmatpush3.msra.mxu0 %v38_v8 }
  0x1f   :  { %173 = vmatprep.subr.mxu0 %v245_v0 }
  0x20   :  { %174 = vmatpush3.msra.mxu0 %v37_v9 }
  0x21   :  { %175 = vmatprep.subr.mxu0 %v245_v0 }
  0x22   :  { %176 = vmatpush3.msra.mxu0 %v36_v10 }
  0x23   :  { %177 = vmatprep.subr.mxu0 %v245_v0 }
  0x24   :  { %178 = vmatpush3.msra.mxu0 %v35_v11 }
  0x25   :  { %179 = vmatprep.subr.mxu0 %v245_v0 }
  0x26   :  { %180 = vmatpush3.msra.mxu0 %v34_v12 }
  0x27   :  { %181 = vmatprep.subr.mxu0 %v245_v0 }
  0x28   :  { %182 = vmatpush3.msra.mxu0 %v33_v13 }
  0x29   :  { %183 = vmatprep.subr.mxu0 %v245_v0 }
  0x2a   :  { %184 = vmatpush3.msra.mxu0 %v32_v14 }
  0x2b   :  { %185 = vmatprep.subr.mxu0 %v245_v0 }
  0x2c   :  { %186 = vmatpush3.msra.mxu0 %v31_v15 }
  0x2d   :  { %187 = vmatprep.subr.mxu0 %v245_v0 }
  0x2e   :  { %188 = vmatpush3.msra.mxu0 %v30_v16 }
  0x2f   :  { %190 = vmatmul.mubr.f32.vlgmr.msra.gmra.mxu0 %v29_v17 }
  0xef   :  { %v119_v19 = vpop.f32.mrf.mxu0 }
  0xf0   :  { %v120_v20 = vadd.f32 %v139_v18, %v119_v19 }
  0xf1   :  { %v191_v21 = vpop.f32.mrf.mxu0 }
  0xf2   :  { %123 = vst [vmem:[#allocation5] sm:$0xff] %v120_v20 }
  0xf3   :  { %229 = shalt.err (!%p226_p9)
}
  0xf4   :  { %133 = dma.vmem_to_hbm [thread:$0]  %s131_s23, 128, %s283_s3, [#allocation4]  }
  0xf5   :  { %240 = dma.done.wait [#allocation4], 128  }
  0xf6   :  { %241 = vsyncadd [#allocation4], 4294967168 }
  0xf7   :  { %137 = vsyncpa [#allocation3], 1 }
  0xf8   :  { %138 = vsyncpa [#allocation4], 1 }

</bundles_post_ra>
